<compile_context>
chip_gen: v6e
topology: v6e:2x2x1
jax: 0.10.0
libtpu: 0.0.40
codegen_flags: <defaults>
</compile_context>

<pallas_src>
import functools

import jax
import jax.numpy as jnp
from jax.experimental import pallas as pl
from jax.experimental.pallas import tpu as pltpu


# --------------------------------------------------------------------------
# Kernels
# --------------------------------------------------------------------------
def _bn1d_train_kernel(x_ref, w_ref, b_ref, rm_ref, rv_ref,
                       o_ref, nrm_ref, nrv_ref, *,
                       eps: float, momentum: float, num_features: int):
    """Training-mode BN1d tile: per-row stats over features + fused
    running-stat update (all outputs lane-dense (bn, F) blocks)."""
    x = x_ref[...].astype(jnp.float32)                                   # (bn, F)
    mu = jnp.sum(x, axis=1, keepdims=True) * (1.0 / num_features)        # (bn, 1)
    diff = x - mu
    # torch.var default: unbiased (divide by F - 1).
    var = jnp.sum(diff * diff, axis=1, keepdims=True) * (1.0 / (num_features - 1))
    inv_std = jax.lax.rsqrt(var + eps)                                   # EUP
    o_ref[...] = ((diff * inv_std) * w_ref[...] + b_ref[...]).astype(o_ref.dtype)

    # Fused running-stat update: (1,F) buffers broadcast against (bn,1) stats
    # -> (bn,F), exactly the module's behavior, written lane-dense.
    one_m = 1.0 - momentum
    nrm_ref[...] = one_m * rm_ref[...] + momentum * mu
    nrv_ref[...] = one_m * rv_ref[...] + momentum * var


def _bn1d_eval_kernel(x_ref, scale_ref, shift_ref, o_ref):
    """Eval-mode BN1d folded to a single per-feature FMA: x * scale + shift."""
    x = x_ref[...].astype(jnp.float32)
    o_ref[...] = (x * scale_ref[...] + shift_ref[...]).astype(o_ref.dtype)


# --------------------------------------------------------------------------
# Tiling helpers (generation-aware)
# --------------------------------------------------------------------------
def _vmem_capacity_bytes() -> int:
    """Physical VMEM of the current generation; conservative fallback (v7x)."""
    try:
        info = pltpu.get_tpu_info()
        cap = getattr(info, "vmem_capacity_bytes", None)
        if cap:
            return int(cap)
    except Exception:
        pass
    return 64 << 20


def _choose_block_n(n: int, f: int, x_itemsize: int, *,
                    n_f32_out_streams: int, vmem_budget_bytes: int,
                    sublane: int) -> int:
    """Batch-tile size.

    Resident bytes per batch row across the pipeline:
      * double-buffered x tile + out tile in x.dtype,
      * double-buffered f32 stat output tiles (training only),
      * ~3 full-tile f32 in-kernel temporaries (cast / diff / scaled).
    The tile is sized so that this footprint fits the per-generation VMEM
    budget, rounded to the dtype's sublane packing, and capped so that the
    grid has >= 2 steps for moderate N (megacore on v7x).
    """
    per_row = f * (4 * x_itemsize + 2 * n_f32_out_streams * 4 + 3 * 4)
    bn = vmem_budget_bytes // max(per_row, 1)
    bn = (bn // sublane) * sublane
    if n > 2 * sublane:
        # Keep at least two grid steps so a "parallel" grid axis can feed
        # both TensorCores on megacore parts.
        max_bn = max(((n - 1) // 2) // sublane * sublane, sublane)
        bn = min(bn, max_bn)
    bn = min(bn, n)
    if bn < sublane or bn >= n:
        return n  # full-dim escape hatch (tiny N, or tile covers everything)
    return bn


# --------------------------------------------------------------------------
# Wrapper
# --------------------------------------------------------------------------
def batchnorm1d_forward(x, weight, bias, running_mean, running_var,
                        *, eps=1e-5, momentum=0.1, training=True):
    """Functional forward matching the homework BatchNorm1d module.

    Returns (output, new_running_mean, new_running_var).  In training mode the
    new running stats are (N, F) (the module's broadcast behavior); in eval
    mode the buffers are returned unchanged.  Eval mode expects (F,)-shaped
    running stats (the module's initial buffers).
    """
    n, f = x.shape
    x_itemsize = jnp.dtype(x.dtype).itemsize
    sublane = 8 * max(1, 4 // x_itemsize)          # 8 f32 / 16 bf16 / 32 int8
    vmem_cap = _vmem_capacity_bytes()
    vmem_budget = vmem_cap // 3                    # tile footprint budget
    vmem_limit = int(min(vmem_cap * 3 // 4, 128 << 20))
    cparams = pltpu.CompilerParams(dimension_semantics=("parallel",),
                                   vmem_limit_bytes=vmem_limit)

    if training:
        bn = _choose_block_n(n, f, x_itemsize, n_f32_out_streams=2,
                             vmem_budget_bytes=vmem_budget, sublane=sublane)
        grid = (pl.cdiv(n, bn),)
        w2 = weight.reshape(1, f).astype(jnp.float32)
        b2 = bias.reshape(1, f).astype(jnp.float32)
        rm2 = running_mean.reshape(1, f).astype(jnp.float32)
        rv2 = running_var.reshape(1, f).astype(jnp.float32)
        kernel = functools.partial(_bn1d_train_kernel, eps=eps,
                                   momentum=momentum, num_features=f)
        out, new_rm, new_rv = pl.pallas_call(
            kernel,
            out_shape=(jax.ShapeDtypeStruct((n, f), x.dtype),
                       jax.ShapeDtypeStruct((n, f), jnp.float32),
                       jax.ShapeDtypeStruct((n, f), jnp.float32)),
            grid=grid,
            in_specs=[
                pl.BlockSpec((bn, f), lambda i: (i, 0)),   # x tile
                pl.BlockSpec((1, f), lambda i: (0, 0)),    # weight
                pl.BlockSpec((1, f), lambda i: (0, 0)),    # bias
                pl.BlockSpec((1, f), lambda i: (0, 0)),    # running_mean
                pl.BlockSpec((1, f), lambda i: (0, 0)),    # running_var
            ],
            out_specs=(
                pl.BlockSpec((bn, f), lambda i: (i, 0)),   # out
                pl.BlockSpec((bn, f), lambda i: (i, 0)),   # new running_mean
                pl.BlockSpec((bn, f), lambda i: (i, 0)),   # new running_var
            ),
            compiler_params=cparams,
        )(x, w2, b2, rm2, rv2)
        return out, new_rm, new_rv

    # Eval mode: fold normalization + affine into a per-feature scale/shift,
    # computed once on (F,)-sized vectors in plain JAX.
    inv_std = jax.lax.rsqrt(running_var.astype(jnp.float32) + eps)        # (F,)
    scale = weight.astype(jnp.float32) * inv_std                          # (F,)
    shift = bias.astype(jnp.float32) - running_mean.astype(jnp.float32) * scale

    bn = _choose_block_n(n, f, x_itemsize, n_f32_out_streams=0,
                         vmem_budget_bytes=vmem_budget, sublane=sublane)
    grid = (pl.cdiv(n, bn),)
    out = pl.pallas_call(
        _bn1d_eval_kernel,
        out_shape=jax.ShapeDtypeStruct((n, f), x.dtype),
        grid=grid,
        in_specs=[
            pl.BlockSpec((bn, f), lambda i: (i, 0)),   # x tile
            pl.BlockSpec((1, f), lambda i: (0, 0)),    # scale
            pl.BlockSpec((1, f), lambda i: (0, 0)),    # shift
        ],
        out_specs=pl.BlockSpec((bn, f), lambda i: (i, 0)),
        compiler_params=cparams,
    )(x, scale.reshape(1, f), shift.reshape(1, f))
    return out, running_mean, running_var


# --------------------------------------------------------------------------
# Self-test
# --------------------------------------------------------------------------
if __name__ == "__main__":
    num_features = 32
    batch = 8
    eps = 1e-5
    momentum = 0.1

    key = jax.random.PRNGKey(0)
    x = jax.random.normal(key, (batch, num_features), dtype=jnp.float32)

    # __init__: weight = ones, bias = zeros, running_mean = zeros, running_var = ones
    weight = jnp.ones((num_features,), dtype=jnp.float32)
    bias = jnp.zeros((num_features,), dtype=jnp.float32)
    running_mean = jnp.zeros((num_features,), dtype=jnp.float32)
    running_var = jnp.ones((num_features,), dtype=jnp.float32)

    # training-mode forward (module default)
    out, new_rm, new_rv = batchnorm1d_forward(
        x, weight, bias, running_mean, running_var,
        eps=eps, momentum=momentum, training=True)
    out = jax.block_until_ready(out)

    # reference check against plain JAX
    mu_ref = jnp.mean(x, axis=1, keepdims=True)
    var_ref = jnp.var(x, axis=1, keepdims=True, ddof=1)
    ref = weight * ((x - mu_ref) / jnp.sqrt(var_ref + eps)) + bias
    assert jnp.allclose(out, ref, atol=1e-5, rtol=1e-5), "train forward mismatch"

    rm_ref = (1.0 - momentum) * running_mean + momentum * mu_ref   # (N, F)
    rv_ref = (1.0 - momentum) * running_var + momentum * var_ref   # (N, F)
    assert jnp.allclose(new_rm, rm_ref, atol=1e-5, rtol=1e-5), "running_mean mismatch"
    assert jnp.allclose(new_rv, rv_ref, atol=1e-5, rtol=1e-5), "running_var mismatch"

    # eval-mode forward (initial (F,) buffers, as in the module before training)
    out_eval, _, _ = batchnorm1d_forward(
        x, weight, bias, running_mean, running_var,
        eps=eps, momentum=momentum, training=False)
    out_eval = jax.block_until_ready(out_eval)
    ref_eval = weight * ((x - running_mean) / jnp.sqrt(running_var + eps)) + bias
    assert jnp.allclose(out_eval, ref_eval, atol=1e-5, rtol=1e-5), "eval forward mismatch"

    print("KERNEL_OK")
</pallas_src>

<mosaic_0001>
module attributes {stable_mosaic.version = 11 : i64} {
  func.func @_bn1d_train_kernel(%arg0: i32, %arg1: memref<8x32xf32, #tpu.memory_space<vmem>>, %arg2: memref<1x32xf32, #tpu.memory_space<vmem>>, %arg3: memref<1x32xf32, #tpu.memory_space<vmem>>, %arg4: memref<1x32xf32, #tpu.memory_space<vmem>>, %arg5: memref<1x32xf32, #tpu.memory_space<vmem>>, %arg6: memref<8x32xf32, #tpu.memory_space<vmem>>, %arg7: memref<8x32xf32, #tpu.memory_space<vmem>>, %arg8: memref<8x32xf32, #tpu.memory_space<vmem>>) attributes {dimension_semantics = [#tpu.dimension_semantics<parallel>], iteration_bounds = array<i64: 1>, scalar_prefetch = 0 : i64, scratch_operands = 0 : i64, tpu.core_type = #tpu.core_type<tc>, window_params = [{transform_indices = @transform_0, window_bounds = array<i64: 8, 32>}, {pipeline_mode = #tpu.pipeline_mode<synchronous>, transform_indices = @transform_1, window_bounds = array<i64: 1, 32>}, {pipeline_mode = #tpu.pipeline_mode<synchronous>, transform_indices = @transform_2, window_bounds = array<i64: 1, 32>}, {pipeline_mode = #tpu.pipeline_mode<synchronous>, transform_indices = @transform_3, window_bounds = array<i64: 1, 32>}, {pipeline_mode = #tpu.pipeline_mode<synchronous>, transform_indices = @transform_4, window_bounds = array<i64: 1, 32>}, {transform_indices = @transform_5, window_bounds = array<i64: 8, 32>}, {transform_indices = @transform_6, window_bounds = array<i64: 8, 32>}, {transform_indices = @transform_7, window_bounds = array<i64: 8, 32>}]} {
    %c0 = arith.constant 0 : index
    %c0_0 = arith.constant 0 : index
    %0 = vector.load %arg1[%c0, %c0_0] : memref<8x32xf32, #tpu.memory_space<vmem>>, vector<8x32xf32>
    %cst = arith.constant dense<0.000000e+00> : vector<8xf32>
    %1 = vector.multi_reduction <add>, %0, %cst [1] : vector<8x32xf32> to vector<8xf32>
    %2 = vector.shape_cast %1 : vector<8xf32> to vector<8x1xf32>
    %cst_1 = arith.constant 3.125000e-02 : f32
    %3 = vector.broadcast %cst_1 : f32 to vector<8x1xf32>
    %4 = arith.mulf %2, %3 : vector<8x1xf32>
    %5 = vector.broadcast %4 : vector<8x1xf32> to vector<8x32xf32>
    %6 = arith.subf %0, %5 : vector<8x32xf32>
    %7 = arith.mulf %6, %6 : vector<8x32xf32>
    %cst_2 = arith.constant dense<0.000000e+00> : vector<8xf32>
    %8 = vector.multi_reduction <add>, %7, %cst_2 [1] : vector<8x32xf32> to vector<8xf32>
    %9 = vector.shape_cast %8 : vector<8xf32> to vector<8x1xf32>
    %cst_3 = arith.constant 0.0322580636 : f32
    %10 = vector.broadcast %cst_3 : f32 to vector<8x1xf32>
    %11 = arith.mulf %9, %10 : vector<8x1xf32>
    %cst_4 = arith.constant 9.99999974E-6 : f32
    %12 = vector.broadcast %cst_4 : f32 to vector<8x1xf32>
    %13 = arith.addf %11, %12 : vector<8x1xf32>
    %14 = math.rsqrt %13 : vector<8x1xf32>
    %15 = vector.broadcast %14 : vector<8x1xf32> to vector<8x32xf32>
    %16 = arith.mulf %6, %15 : vector<8x32xf32>
    %c0_5 = arith.constant 0 : index
    %c0_6 = arith.constant 0 : index
    %17 = vector.load %arg2[%c0_5, %c0_6] : memref<1x32xf32, #tpu.memory_space<vmem>>, vector<1x32xf32>
    %18 = vector.broadcast %17 : vector<1x32xf32> to vector<8x32xf32>
    %19 = arith.mulf %16, %18 : vector<8x32xf32>
    %c0_7 = arith.constant 0 : index
    %c0_8 = arith.constant 0 : index
    %20 = vector.load %arg3[%c0_7, %c0_8] : memref<1x32xf32, #tpu.memory_space<vmem>>, vector<1x32xf32>
    %21 = vector.broadcast %20 : vector<1x32xf32> to vector<8x32xf32>
    %22 = arith.addf %19, %21 : vector<8x32xf32>
    %c0_9 = arith.constant 0 : index
    %c0_10 = arith.constant 0 : index
    %23 = vector.load %arg6[%c0_9, %c0_10] : memref<8x32xf32, #tpu.memory_space<vmem>>, vector<8x32xf32>
    tpu.vector_store %arg6[%c0_9, %c0_10], %22 {strides = array<i32>} : memref<8x32xf32, #tpu.memory_space<vmem>>, vector<8x32xf32>,
    %c0_11 = arith.constant 0 : index
    %c0_12 = arith.constant 0 : index
    %24 = vector.load %arg4[%c0_11, %c0_12] : memref<1x32xf32, #tpu.memory_space<vmem>>, vector<1x32xf32>
    %cst_13 = arith.constant 0.899999976 : f32
    %25 = vector.broadcast %cst_13 : f32 to vector<1x32xf32>
    %26 = arith.mulf %25, %24 : vector<1x32xf32>
    %cst_14 = arith.constant 1.000000e-01 : f32
    %27 = vector.broadcast %cst_14 : f32 to vector<8x1xf32>
    %28 = arith.mulf %27, %4 : vector<8x1xf32>
    %29 = vector.broadcast %26 : vector<1x32xf32> to vector<8x32xf32>
    %30 = vector.broadcast %28 : vector<8x1xf32> to vector<8x32xf32>
    %31 = arith.addf %29, %30 : vector<8x32xf32>
    %c0_15 = arith.constant 0 : index
    %c0_16 = arith.constant 0 : index
    %32 = vector.load %arg7[%c0_15, %c0_16] : memref<8x32xf32, #tpu.memory_space<vmem>>, vector<8x32xf32>
    tpu.vector_store %arg7[%c0_15, %c0_16], %31 {strides = array<i32>} : memref<8x32xf32, #tpu.memory_space<vmem>>, vector<8x32xf32>,
    %c0_17 = arith.constant 0 : index
    %c0_18 = arith.constant 0 : index
    %33 = vector.load %arg5[%c0_17, %c0_18] : memref<1x32xf32, #tpu.memory_space<vmem>>, vector<1x32xf32>
    %cst_19 = arith.constant 0.899999976 : f32
    %34 = vector.broadcast %cst_19 : f32 to vector<1x32xf32>
    %35 = arith.mulf %34, %33 : vector<1x32xf32>
    %cst_20 = arith.constant 1.000000e-01 : f32
    %36 = vector.broadcast %cst_20 : f32 to vector<8x1xf32>
    %37 = arith.mulf %36, %11 : vector<8x1xf32>
    %38 = vector.broadcast %35 : vector<1x32xf32> to vector<8x32xf32>
    %39 = vector.broadcast %37 : vector<8x1xf32> to vector<8x32xf32>
    %40 = arith.addf %38, %39 : vector<8x32xf32>
    %c0_21 = arith.constant 0 : index
    %c0_22 = arith.constant 0 : index
    %41 = vector.load %arg8[%c0_21, %c0_22] : memref<8x32xf32, #tpu.memory_space<vmem>>, vector<8x32xf32>
    tpu.vector_store %arg8[%c0_21, %c0_22], %40 {strides = array<i32>} : memref<8x32xf32, #tpu.memory_space<vmem>>, vector<8x32xf32>,
    return
  }
  func.func @transform_0(%arg0: i32) -> (i32, i32) {
    %c0_i32 = arith.constant 0 : i32
    %c0_i32_0 = arith.constant 0 : i32
    return %arg0, %c0_i32 : i32, i32
  }
  func.func @transform_1(%arg0: i32) -> (i32, i32) {
    %c0_i32 = arith.constant 0 : i32
    %c0_i32_0 = arith.constant 0 : i32
    %c0_i32_1 = arith.constant 0 : i32
    return %c0_i32, %c0_i32_0 : i32, i32
  }
  func.func @transform_2(%arg0: i32) -> (i32, i32) {
    %c0_i32 = arith.constant 0 : i32
    %c0_i32_0 = arith.constant 0 : i32
    %c0_i32_1 = arith.constant 0 : i32
    return %c0_i32, %c0_i32_0 : i32, i32
  }
  func.func @transform_3(%arg0: i32) -> (i32, i32) {
    %c0_i32 = arith.constant 0 : i32
    %c0_i32_0 = arith.constant 0 : i32
    %c0_i32_1 = arith.constant 0 : i32
    return %c0_i32, %c0_i32_0 : i32, i32
  }
  func.func @transform_4(%arg0: i32) -> (i32, i32) {
    %c0_i32 = arith.constant 0 : i32
    %c0_i32_0 = arith.constant 0 : i32
    %c0_i32_1 = arith.constant 0 : i32
    return %c0_i32, %c0_i32_0 : i32, i32
  }
  func.func @transform_5(%arg0: i32) -> (i32, i32) {
    %c0_i32 = arith.constant 0 : i32
    %c0_i32_0 = arith.constant 0 : i32
    return %arg0, %c0_i32 : i32, i32
  }
  func.func @transform_6(%arg0: i32) -> (i32, i32) {
    %c0_i32 = arith.constant 0 : i32
    %c0_i32_0 = arith.constant 0 : i32
    return %arg0, %c0_i32 : i32, i32
  }
  func.func @transform_7(%arg0: i32) -> (i32, i32) {
    %c0_i32 = arith.constant 0 : i32
    %c0_i32_0 = arith.constant 0 : i32
    return %arg0, %c0_i32 : i32, i32
  }
}

</mosaic_0001>

<bundles_post_ra>
// kernel: tpu_custom_call.1
= control target key start
LH: loop header
LB: loop body
LE: loop exit
PB: predicated region body
PF: predicated region fallthrough
CT: control target
= control target key end

     0   :  { %13 = vsyncpa [#allocation3], 0  ;;  %s300_s0 = inlined_call_operand.hbm [shape: f32[8,32], index: 0, kind: input, shape index: {}]   ;;  %s301_s1 = inlined_call_operand.vmem [shape: f32[1,32], index: 1, kind: input, shape index: {}]   ;;  %s302_s2 = inlined_call_operand.vmem [shape: f32[1,32], index: 2, kind: input, shape index: {}]   ;;  %s303_s3 = inlined_call_operand.vmem [shape: f32[1,32], index: 3, kind: input, shape index: {}]   ;;  %s304_s4 = inlined_call_operand.vmem [shape: f32[1,32], index: 4, kind: input, shape index: {}]   ;;  %s305_s5 = inlined_call_operand.hbm [shape: f32[8,32], index: 5, kind: output, shape index: {0}]   ;;  %s306_s6 = inlined_call_operand.hbm [shape: f32[8,32], index: 6, kind: output, shape index: {1}]   ;;  %s307_s7 = inlined_call_operand.hbm [shape: f32[8,32], index: 7, kind: output, shape index: {2}]  }
   0x1   :  { %14 = vsyncpa [#allocation4], 0 }
   0x2   :  { %15 = vsyncpa [#allocation7], 0  ;;  %s227_s24 = smov [#allocation2]  }
   0x3   :  { %s22_s25 = sshll.u32 %s227_s24, 4  ;;  %s23_s25 = int_to_ptr.vmem [resolvable:$true] %s22_s25 }
   0x4   :  { %s149_s26 = scalar_lea.vmem %s23_s25, 128  ;;  %p154_p1 = scmp.lt.s32.totalorder %s23_s25, %s23_s25 }
   0x5   :  { %p150_p0 = scmp.ne.s32.totalorder %s23_s25, %s149_s26  ;;  %p155_p2 = scmp.lt.s32.totalorder %s149_s26, %s149_s26 }
   0x7   :  { %p156_p3 = por %p155_p2, %p154_p1 }
   0x9   :  { %p157_p4 = pnand %p156_p3, %p150_p0 }
   0xb   :  { %160 = shalt.err (!%p157_p4)
}
   0xc   :  { %25 = dma.hbm_to_vmem [thread:$0]  %s300_s0, 128, %s23_s25, [#allocation3]  }
   0xd   :  { %221 = dma.done.wait [#allocation3], 128  }
   0xe   :  { %222 = vsyncadd [#allocation3], 4294967168  ;;  %vm38_vm0 = vcmask 261120   ;;  %v37_v0 = vld [vmem:[#allocation2] sm:$0xff]  ;;  %v73_v2 = vlaneseq  ;;  %s228_s0 = smov [#allocation6]  }
   0xf   :  { %v39_v1 = vsel %vm38_vm0, %v37_v0, 0.0  ;;  %v69_v4 = vld [vmem:[%s303_s3] sm:$0x1]  ;;  %s107_s8 = sshll.u32 %s228_s0, 4  ;;  %s108_s8 = int_to_ptr.vmem [resolvable:$true] %s107_s8 }
  0x10   :  { %40 = vadd.xlane.f32.xlu0 %v39_v1  ;;  %v74_v3 = vshrl.u32 %v73_v2, 7  ;;  %v70_v5 = vmul.f32 0.9, %v69_v4  ;;  %s161_s9 = scalar_lea.vmem %s108_s8, 128  ;;  %p166_p6 = scmp.lt.s32.totalorder %s108_s8, %s108_s8 }
  0x11   :  { %p162_p5 = scmp.ne.s32.totalorder %s108_s8, %s161_s9  ;;  %p167_p7 = scmp.lt.s32.totalorder %s161_s9, %s161_s9 }
  0x12   :  { %v75_v6 = vsub.s32 0, %v74_v3 }
  0x13   :  { %p168_p8 = por %p167_p7, %p166_p6 }
  0x14   :  { %v76_v8 = vrot.slane %v70_v5, %v75_v6 }
  0x15   :  { %p169_p9 = pnand %p168_p8, %p162_p5 }
  0x99   :  { %v41_v7 = vpop.xlane.xlu0 %40 }
  0x9a   :  { %v42_v9 = vmul.f32 0.03125, %v41_v7 }
  0x9c   :  { %v43_v10 = vsub.f32 %v37_v0, %v42_v9  ;;  %v71_v11 = vmul.f32 0.1, %v42_v9 }
  0x9e   :  { %v78_v12 = vadd.f32 %v76_v8, %v71_v11  ;;  %v44_v13 = vmul.f32 %v43_v10, %v43_v10 }
  0xa0   :  { %79 = vst.msk [vmem:[#allocation6] sm:$0xff] %vm38_vm0, %v78_v12  ;;  %v45_v14 = vsel %vm38_vm0, %v44_v13, 0.0 }
  0xa1   :  { %46 = vadd.xlane.f32.xlu0 %v45_v14 }
  0xa2   :  { %172 = shalt.err (!%p169_p9)
}
  0xa3   :  { %110 = dma.vmem_to_hbm [thread:$0]  %s108_s8, 128, %s306_s6, [#allocation7]   ;;  %v80_v15 = vld [vmem:[%s304_s4] sm:$0x1] }
  0xa4   :  { %v81_v16 = vmul.f32 0.9, %v80_v15  ;;  %s229_s13 = smov [#allocation8]  }
  0xa5   :  { %s117_s14 = sshll.u32 %s229_s13, 4  ;;  %s118_s14 = int_to_ptr.vmem [resolvable:$true] %s117_s14 }
  0xa6   :  { %v87_v18 = vrot.slane %v81_v16, %v75_v6  ;;  %s181_s15 = scalar_lea.vmem %s118_s14, 128  ;;  %p186_p11 = scmp.lt.s32.totalorder %s118_s14, %s118_s14 }
  0xa7   :  { %p182_p10 = scmp.ne.s32.totalorder %s118_s14, %s181_s15  ;;  %p187_p12 = scmp.lt.s32.totalorder %s181_s15, %s181_s15 }
  0xa9   :  { %p188_p13 = por %p187_p12, %p186_p11 }
  0xab   :  { %p189_p0 = pnand %p188_p13, %p182_p10 }
 0x12a   :  { %v47_v17 = vpop.xlane.xlu0 %46 }
 0x12b   :  { %v48_v19 = vmul.f32 0.032258064, %v47_v17 }
 0x12d   :  { %v49_v20 = vadd.f32 1e-05, %v48_v19  ;;  %v82_v21 = vmul.f32 0.1, %v48_v19 }
 0x12f   :  { %139 = vrsqrt.f32 %v49_v20  ;;  %v89_v22 = vadd.f32 %v87_v18, %v82_v21 }
 0x131   :  { %90 = vst.msk [vmem:[#allocation8] sm:$0xff] %vm38_vm0, %v89_v22 }
 0x132   :  { %192 = shalt.err (!%p189_p0)
}
 0x133   :  { %120 = dma.vmem_to_hbm [thread:$0]  %s118_s14, 128, %s307_s7, [#allocation7]   ;;  %v133_v24 = vld [vmem:[%s301_s1] ss:$0 sm:$0xff] }
 0x134   :  { %v134_v26 = vld [vmem:[%s302_s2] ss:$0 sm:$0xff]  ;;  %s230_s20 = smov [#allocation5]  }
 0x135   :  { %s97_s21 = sshll.u32 %s230_s20, 4  ;;  %s98_s21 = int_to_ptr.vmem [resolvable:$true] %s97_s21 }
 0x136   :  { %s201_s22 = scalar_lea.vmem %s98_s21, 128  ;;  %p206_p2 = scmp.lt.s32.totalorder %s98_s21, %s98_s21 }
 0x137   :  { %p202_p1 = scmp.ne.s32.totalorder %s98_s21, %s201_s22  ;;  %p207_p3 = scmp.lt.s32.totalorder %s201_s22, %s201_s22 }
 0x139   :  { %p208_p4 = por %p207_p3, %p206_p2 }
 0x13b   :  { %p209_p5 = pnand %p208_p4, %p202_p1 }
 0x13c   :  { %v140_v23 = vpop.eup %139 }
 0x13d   :  { %v51_v25 = vmul.f32 %v140_v23, %v43_v10 }
 0x13f   :  { %v59_v27 = vmul.f32 %v133_v24, %v51_v25 }
 0x141   :  { %v67_v28 = vadd.f32 %v134_v26, %v59_v27 }
 0x143   :  { %68 = vst.msk [vmem:[#allocation5] sm:$0xff] %vm38_vm0, %v67_v28 }
 0x144   :  { %212 = shalt.err (!%p209_p5)
}
 0x145   :  { %100 = dma.vmem_to_hbm [thread:$0]  %s98_s21, 128, %s305_s5, [#allocation4]  }
 0x146   :  { %223 = dma.done.wait [#allocation4], 128  }
 0x147   :  { %224 = vsyncadd [#allocation4], 4294967168 }
 0x148   :  { %225 = dma.done.wait [#allocation7], 256  }
 0x149   :  { %226 = vsyncadd [#allocation7], 4294967040 }
 0x14a   :  { %130 = vsyncpa [#allocation3], 1 }
 0x14b   :  { %131 = vsyncpa [#allocation4], 1 }
 0x14c   :  { %132 = vsyncpa [#allocation7], 1 }

</bundles_post_ra>
